<compile_context>
chip_gen: v7x
topology: tpu7x:2x2x1
jax: 0.10.0
libtpu: 0.0.40
codegen_flags: <defaults>
</compile_context>

<pallas_src>
import jax
import jax.numpy as jnp
from jax.experimental import pallas as pl
from jax.experimental.pallas import tpu as pltpu


def _round_up(n, m):
    return ((n + m - 1) // m) * m


def _pad2(a, rows, cols):
    pr, pc = rows - a.shape[0], cols - a.shape[1]
    if pr == 0 and pc == 0:
        return a
    return jnp.pad(a, ((0, pr), (0, pc)))


def mlp_kernel(x_ref, w1_ref, b1_ref, w2_ref, b2_ref, w3_ref, b3_ref, o_ref):
    x = x_ref[...]                                       # (tm, n_obs) bf16
    # layer1 + ReLU (bf16 operands, f32 accumulate / bias / ReLU)
    h1 = jnp.dot(x, w1_ref[...], preferred_element_type=jnp.float32) + b1_ref[...]
    h1 = jnp.maximum(h1, 0.0).astype(w2_ref.dtype)       # -> bf16 for next MXU pass
    # layer2 + ReLU
    h2 = jnp.dot(h1, w2_ref[...], preferred_element_type=jnp.float32) + b2_ref[...]
    h2 = jnp.maximum(h2, 0.0).astype(w3_ref.dtype)
    # layer3 (no activation) -- lane-dense f32 store (padded output width)
    o_ref[...] = (jnp.dot(h2, w3_ref[...], preferred_element_type=jnp.float32)
                  + b3_ref[...]).astype(o_ref.dtype)


def _vmem_limit_bytes(tm, n_obs, hid_p, act_p):
    w_bytes = 2 * (n_obs * hid_p + hid_p * hid_p + hid_p * act_p)  # bf16, 1x buffered
    b_bytes = 4 * (2 * hid_p + act_p)                              # f32, 1x buffered
    x_bytes = 2 * (2 * tm * n_obs)                                 # bf16, 2x buffered
    o_bytes = 2 * (4 * tm * act_p)                                 # f32,  2x buffered
    act_bytes = 3 * 4 * tm * hid_p                                 # live activations headroom
    total = int(1.5 * (w_bytes + b_bytes + x_bytes + o_bytes + act_bytes))
    return max(8 << 20, min(total, 64 << 20))


def network_forward(x, params, *, tm_max=256):
    """x: (B, n_obs) f32; params dict of (in,out)-layout weights. -> (B, n_actions) f32."""
    w1, b1, w2, b2, w3, b3 = (params["w1"], params["b1"], params["w2"],
                              params["b2"], params["w3"], params["b3"])
    B, n_obs = x.shape
    hid = w1.shape[1]
    n_act = w3.shape[1]

    LANE, SUB = 128, 8
    hid_p = _round_up(hid, LANE)
    act_p = _round_up(n_act, LANE)

    # Batch tiling: fill sublanes; ensure >=2 grid steps when there is enough
    # batch to split (v7x megacore), cap the tile at tm_max.
    B_sub = _round_up(B, SUB)
    if B_sub <= SUB:
        tm = B_sub
    elif B_sub <= tm_max:
        tm = _round_up(pl.cdiv(B_sub, 2), SUB)
    else:
        tm = tm_max
    B_p = _round_up(B, tm)
    grid = (B_p // tm,)

    # x: pad batch only (last dim stays the full, unpadded n_obs), bf16 operands.
    x_p = _pad2(x, B_p, n_obs).astype(jnp.bfloat16)
    # Weights: bf16, lane-padded on the output dim (zero-padding is exact
    # through the Linear/ReLU chain). Biases stay f32.
    w1_p = _pad2(w1, n_obs, hid_p).astype(jnp.bfloat16)
    b1_p = _pad2(b1, 1, hid_p)
    w2_p = _pad2(w2, hid_p, hid_p).astype(jnp.bfloat16)
    b2_p = _pad2(b2, 1, hid_p)
    w3_p = _pad2(w3, hid_p, act_p).astype(jnp.bfloat16)
    b3_p = _pad2(b3, 1, act_p)

    # Grid-invariant weights/biases: full-array blocks, constant index_map,
    # single-buffered (no pipelining needed) -> VMEM-resident across the grid.
    full = lambda a: pl.BlockSpec(a.shape, lambda i: (0,) * a.ndim,
                                  pipeline_mode=pl.Buffered(1))

    flops = 2 * B_p * (n_obs * hid_p + hid_p * hid_p + hid_p * act_p)
    bytes_accessed = (2 * (B_p * n_obs + n_obs * hid_p + hid_p * hid_p + hid_p * act_p)
                      + 4 * (2 * hid_p + act_p)
                      + 4 * B_p * act_p)
    cost = pl.CostEstimate(flops=flops, transcendentals=0,
                           bytes_accessed=bytes_accessed)

    out_p = pl.pallas_call(
        mlp_kernel,
        out_shape=jax.ShapeDtypeStruct((B_p, act_p), jnp.float32),
        grid=grid,
        in_specs=[
            pl.BlockSpec((tm, n_obs), lambda i: (i, 0)),   # full-extent last dim (no lane pad)
            full(w1_p), full(b1_p), full(w2_p), full(b2_p), full(w3_p), full(b3_p),
        ],
        out_specs=pl.BlockSpec((tm, act_p), lambda i: (i, 0)),
        compiler_params=pltpu.CompilerParams(
            dimension_semantics=("parallel",),
            vmem_limit_bytes=_vmem_limit_bytes(tm, n_obs, hid_p, act_p)),
        cost_estimate=cost,
    )(x_p, w1_p, b1_p, w2_p, b2_p, w3_p, b3_p)

    # Strip batch/lane padding outside the kernel.
    return out_p[:B, :n_act]


def init_params(key, n_observations, n_actions, hid_dim):
    """Deterministic init mimicking nn.Linear's uniform(-1/sqrt(fan_in), ...)."""
    ks = jax.random.split(key, 6)

    def lin(kw, kb, fan_in, fan_out):
        bound = 1.0 / jnp.sqrt(fan_in)
        w = jax.random.uniform(kw, (fan_in, fan_out), jnp.float32, -bound, bound)
        b = jax.random.uniform(kb, (1, fan_out), jnp.float32, -bound, bound)
        return w, b

    w1, b1 = lin(ks[0], ks[1], n_observations, hid_dim)
    w2, b2 = lin(ks[2], ks[3], hid_dim, hid_dim)
    w3, b3 = lin(ks[4], ks[5], hid_dim, n_actions)
    return dict(w1=w1, b1=b1, w2=w2, b2=b2, w3=w3, b3=b3)


def reference_forward_f32(x, p):
    h1 = jnp.maximum(x @ p["w1"] + p["b1"], 0.0)
    h2 = jnp.maximum(h1 @ p["w2"] + p["b2"], 0.0)
    return h2 @ p["w3"] + p["b3"]


def reference_forward_mixed(x, p):
    """Mirrors the kernel's dtype flow: bf16 operands, f32 accumulation."""
    bf = jnp.bfloat16
    h1 = jnp.dot(x.astype(bf), p["w1"].astype(bf),
                 preferred_element_type=jnp.float32) + p["b1"]
    h1 = jnp.maximum(h1, 0.0).astype(bf)
    h2 = jnp.dot(h1, p["w2"].astype(bf),
                 preferred_element_type=jnp.float32) + p["b2"]
    h2 = jnp.maximum(h2, 0.0).astype(bf)
    return jnp.dot(h2, p["w3"].astype(bf),
                   preferred_element_type=jnp.float32) + p["b3"]


if __name__ == "__main__":
    n_observations, n_actions, hid_dim = 16, 8, 32
    batch = 2

    key = jax.random.PRNGKey(0)
    k_x, k_p = jax.random.split(key)
    x = jax.random.normal(k_x, (batch, n_observations), jnp.float32)
    params = init_params(k_p, n_observations, n_actions, hid_dim)

    out = jax.block_until_ready(network_forward(x, params))
    assert out.shape == (batch, n_actions)
    # Tight check vs. a dtype-matched reference; loose check vs. the pure-f32 module.
    ref_mixed = reference_forward_mixed(x, params)
    ref_f32 = reference_forward_f32(x, params)
    assert jnp.allclose(out, ref_mixed, atol=2e-2, rtol=2e-2), "mismatch vs mixed-precision ref"
    assert jnp.allclose(out, ref_f32, atol=1e-1, rtol=1e-1), "mismatch vs f32 reference"

    # Also exercise the multi-tile (grid > 1) batched path once.
    xb = jax.random.normal(k_x, (600, n_observations), jnp.float32)
    outb = jax.block_until_ready(network_forward(xb, params))
    assert outb.shape == (600, n_actions)
    refb = reference_forward_mixed(xb, params)
    assert jnp.allclose(outb, refb, atol=2e-2, rtol=2e-2), "batched mismatch"

    print("KERNEL_OK")
</pallas_src>

<mosaic_0001>
module attributes {stable_mosaic.version = 11 : i64} {
  func.func @mlp_kernel(%arg0: i32, %arg1: memref<8x16xbf16, #tpu.memory_space<vmem>>, %arg2: memref<16x128xbf16, #tpu.memory_space<vmem>>, %arg3: memref<1x128xf32, #tpu.memory_space<vmem>>, %arg4: memref<128x128xbf16, #tpu.memory_space<vmem>>, %arg5: memref<1x128xf32, #tpu.memory_space<vmem>>, %arg6: memref<128x128xbf16, #tpu.memory_space<vmem>>, %arg7: memref<1x128xf32, #tpu.memory_space<vmem>>, %arg8: memref<8x128xf32, #tpu.memory_space<vmem>>) attributes {dimension_semantics = [#tpu.dimension_semantics<parallel>], iteration_bounds = array<i64: 1>, scalar_prefetch = 0 : i64, scratch_operands = 0 : i64, tpu.core_type = #tpu.core_type<tc>, window_params = [{transform_indices = @transform_0, window_bounds = array<i64: 8, 16>}, {pipeline_mode = #tpu.pipeline_mode<synchronous>, transform_indices = @transform_1, window_bounds = array<i64: 16, 128>}, {pipeline_mode = #tpu.pipeline_mode<synchronous>, transform_indices = @transform_2, window_bounds = array<i64: 1, 128>}, {pipeline_mode = #tpu.pipeline_mode<synchronous>, transform_indices = @transform_3, window_bounds = array<i64: 128, 128>}, {pipeline_mode = #tpu.pipeline_mode<synchronous>, transform_indices = @transform_4, window_bounds = array<i64: 1, 128>}, {pipeline_mode = #tpu.pipeline_mode<synchronous>, transform_indices = @transform_5, window_bounds = array<i64: 128, 128>}, {pipeline_mode = #tpu.pipeline_mode<synchronous>, transform_indices = @transform_6, window_bounds = array<i64: 1, 128>}, {transform_indices = @transform_7, window_bounds = array<i64: 8, 128>}]} {
    %c0 = arith.constant 0 : index
    %c0_0 = arith.constant 0 : index
    %0 = vector.load %arg1[%c0, %c0_0] : memref<8x16xbf16, #tpu.memory_space<vmem>>, vector<8x16xbf16>
    %c0_1 = arith.constant 0 : index
    %c0_2 = arith.constant 0 : index
    %1 = vector.load %arg2[%c0_1, %c0_2] : memref<16x128xbf16, #tpu.memory_space<vmem>>, vector<16x128xbf16>
    %cst = arith.constant dense<0.000000e+00> : vector<8x128xf32>
    %2 = tpu.matmul %0, %1, %cst {dimension_numbers = #tpu.dot_dimension_numbers<[1], [0], [0], [1], [0, 0, 1, 1], [], []>} : vector<8x16xbf16>, vector<16x128xbf16>, vector<8x128xf32> -> vector<8x128xf32>
    %c0_3 = arith.constant 0 : index
    %c0_4 = arith.constant 0 : index
    %3 = vector.load %arg3[%c0_3, %c0_4] : memref<1x128xf32, #tpu.memory_space<vmem>>, vector<1x128xf32>
    %4 = vector.broadcast %3 : vector<1x128xf32> to vector<8x128xf32>
    %5 = arith.addf %2, %4 : vector<8x128xf32>
    %cst_5 = arith.constant 0.000000e+00 : f32
    %6 = vector.broadcast %cst_5 : f32 to vector<8x128xf32>
    %7 = arith.maximumf %5, %6 : vector<8x128xf32>
    %8 = arith.truncf %7 : vector<8x128xf32> to vector<8x128xbf16>
    %c0_6 = arith.constant 0 : index
    %c0_7 = arith.constant 0 : index
    %9 = vector.load %arg4[%c0_6, %c0_7] : memref<128x128xbf16, #tpu.memory_space<vmem>>, vector<128x128xbf16>
    %cst_8 = arith.constant dense<0.000000e+00> : vector<8x128xf32>
    %10 = tpu.matmul %8, %9, %cst_8 {dimension_numbers = #tpu.dot_dimension_numbers<[1], [0], [0], [1], [0, 0, 1, 1], [], []>} : vector<8x128xbf16>, vector<128x128xbf16>, vector<8x128xf32> -> vector<8x128xf32>
    %c0_9 = arith.constant 0 : index
    %c0_10 = arith.constant 0 : index
    %11 = vector.load %arg5[%c0_9, %c0_10] : memref<1x128xf32, #tpu.memory_space<vmem>>, vector<1x128xf32>
    %12 = vector.broadcast %11 : vector<1x128xf32> to vector<8x128xf32>
    %13 = arith.addf %10, %12 : vector<8x128xf32>
    %cst_11 = arith.constant 0.000000e+00 : f32
    %14 = vector.broadcast %cst_11 : f32 to vector<8x128xf32>
    %15 = arith.maximumf %13, %14 : vector<8x128xf32>
    %16 = arith.truncf %15 : vector<8x128xf32> to vector<8x128xbf16>
    %c0_12 = arith.constant 0 : index
    %c0_13 = arith.constant 0 : index
    %17 = vector.load %arg6[%c0_12, %c0_13] : memref<128x128xbf16, #tpu.memory_space<vmem>>, vector<128x128xbf16>
    %cst_14 = arith.constant dense<0.000000e+00> : vector<8x128xf32>
    %18 = tpu.matmul %16, %17, %cst_14 {dimension_numbers = #tpu.dot_dimension_numbers<[1], [0], [0], [1], [0, 0, 1, 1], [], []>} : vector<8x128xbf16>, vector<128x128xbf16>, vector<8x128xf32> -> vector<8x128xf32>
    %c0_15 = arith.constant 0 : index
    %c0_16 = arith.constant 0 : index
    %19 = vector.load %arg7[%c0_15, %c0_16] : memref<1x128xf32, #tpu.memory_space<vmem>>, vector<1x128xf32>
    %20 = vector.broadcast %19 : vector<1x128xf32> to vector<8x128xf32>
    %21 = arith.addf %18, %20 : vector<8x128xf32>
    %c0_17 = arith.constant 0 : index
    %c0_18 = arith.constant 0 : index
    %22 = vector.load %arg8[%c0_17, %c0_18] : memref<8x128xf32, #tpu.memory_space<vmem>>, vector<8x128xf32>
    tpu.vector_store %arg8[%c0_17, %c0_18], %21 {strides = array<i32>} : memref<8x128xf32, #tpu.memory_space<vmem>>, vector<8x128xf32>,
    return
  }
  func.func @transform_0(%arg0: i32) -> (i32, i32) {
    %c0_i32 = arith.constant 0 : i32
    %c0_i32_0 = arith.constant 0 : i32
    return %arg0, %c0_i32 : i32, i32
  }
  func.func @transform_1(%arg0: i32) -> (i32, i32) {
    %c0_i32 = arith.constant 0 : i32
    %c0_i32_0 = arith.constant 0 : i32
    %c0_i32_1 = arith.constant 0 : i32
    return %c0_i32, %c0_i32_0 : i32, i32
  }
  func.func @transform_2(%arg0: i32) -> (i32, i32) {
    %c0_i32 = arith.constant 0 : i32
    %c0_i32_0 = arith.constant 0 : i32
    %c0_i32_1 = arith.constant 0 : i32
    return %c0_i32, %c0_i32_0 : i32, i32
  }
  func.func @transform_3(%arg0: i32) -> (i32, i32) {
    %c0_i32 = arith.constant 0 : i32
    %c0_i32_0 = arith.constant 0 : i32
    %c0_i32_1 = arith.constant 0 : i32
    return %c0_i32, %c0_i32_0 : i32, i32
  }
  func.func @transform_4(%arg0: i32) -> (i32, i32) {
    %c0_i32 = arith.constant 0 : i32
    %c0_i32_0 = arith.constant 0 : i32
    %c0_i32_1 = arith.constant 0 : i32
    return %c0_i32, %c0_i32_0 : i32, i32
  }
  func.func @transform_5(%arg0: i32) -> (i32, i32) {
    %c0_i32 = arith.constant 0 : i32
    %c0_i32_0 = arith.constant 0 : i32
    %c0_i32_1 = arith.constant 0 : i32
    return %c0_i32, %c0_i32_0 : i32, i32
  }
  func.func @transform_6(%arg0: i32) -> (i32, i32) {
    %c0_i32 = arith.constant 0 : i32
    %c0_i32_0 = arith.constant 0 : i32
    %c0_i32_1 = arith.constant 0 : i32
    return %c0_i32, %c0_i32_0 : i32, i32
  }
  func.func @transform_7(%arg0: i32) -> (i32, i32) {
    %c0_i32 = arith.constant 0 : i32
    %c0_i32_0 = arith.constant 0 : i32
    return %arg0, %c0_i32 : i32, i32
  }
}

</mosaic_0001>

<bundles_post_ra>
// kernel: tpu_custom_call.1
= control target key start
LH: loop header
LB: loop body
LE: loop exit
PB: predicated region body
PF: predicated region fallthrough
CT: control target
= control target key end

     0   :  { %12 = vsyncpa [#allocation3], 0  ;;  %s763_s0 = inlined_call_operand.hbm [shape: bf16[8,16], index: 0, kind: input, shape index: {}]   ;;  %s764_s1 = inlined_call_operand.hbm [shape: bf16[16,128], index: 1, kind: input, shape index: {}]   ;;  %s765_s2 = inlined_call_operand.vmem [shape: f32[1,128], index: 2, kind: input, shape index: {}]   ;;  %s766_s3 = inlined_call_operand.hbm [shape: bf16[128,128], index: 3, kind: input, shape index: {}]   ;;  %s767_s4 = inlined_call_operand.vmem [shape: f32[1,128], index: 4, kind: input, shape index: {}]   ;;  %s768_s5 = inlined_call_operand.hbm [shape: bf16[128,128], index: 5, kind: input, shape index: {}]   ;;  %s769_s6 = inlined_call_operand.vmem [shape: f32[1,128], index: 6, kind: input, shape index: {}]   ;;  %s770_s7 = inlined_call_operand.hbm [shape: f32[8,128], index: 7, kind: output, shape index: {}]  }
   0x1   :  { %13 = vsyncpa [#allocation6], 0 }
   0x2   :  { %14 = vsyncpa [#allocation9], 0 }
   0x3   :  { %15 = vsyncpa [#allocation4], 0  ;;  %s616_s24 = smov [#allocation5]   ;;  %s498_s28 = scalar_lea.hbm %s764_s1, 128 }
   0x4   :  { %s31_s25 = sshll.u32 %s616_s24, 4  ;;  %p499_p0 = scmp.ne.s32.totalorder %s764_s1, %s498_s28  ;;  %s32_s25 = int_to_ptr.vmem [resolvable:$true] %s31_s25 }
   0x5   :  { %p502_p1 = scmp.lt.u32.totalorder %s498_s28, %s764_s1 }
   0x7   :  { %p504_p2 = pnand %p502_p1, %p499_p0 }
   0x9   :  { %507 = shalt.err (!%p504_p2)
}
   0xa   :  { %s508_s10 = scalar_lea.vmem %s32_s25, 128  ;;  %p513_p4 = scmp.lt.s32.totalorder %s32_s25, %s32_s25 }
   0xb   :  { %p509_p3 = scmp.ne.s32.totalorder %s32_s25, %s508_s10  ;;  %p514_p5 = scmp.lt.s32.totalorder %s508_s10, %s508_s10 }
   0xd   :  { %p515_p6 = por %p514_p5, %p513_p4 }
   0xf   :  { %p516_p7 = pnand %p515_p6, %p509_p3 }
  0x11   :  { %519 = shalt.err (!%p516_p7)
}
  0x12   :  { %s617_s11 = smov 64   ;;  %s618_s12 = smov 4  }
  0x13   :  { %37 = dma.hbm_to_vmem [thread:$0]  %s764_s1, 128, %s32_s25, [#allocation6], %s617_s11, %s617_s11, %s618_s12  }
  0x14   :  { %s619_s15 = smov [#allocation2]   ;;  %s620_s17 = smov [#allocation7]  }
  0x15   :  { %s22_s16 = sshll.u32 %s619_s15, 4  ;;  %s45_s18 = sshll.u32 %s620_s17, 4  ;;  %s23_s16 = int_to_ptr.vmem [resolvable:$true] %s22_s16  ;;  %s46_s18 = int_to_ptr.vmem [resolvable:$true] %s45_s18 }
  0x16   :  { %s520_s21 = scalar_lea.hbm %s763_s0, 64 }
  0x17   :  { %p521_p8 = scmp.ne.s32.totalorder %s763_s0, %s520_s21  ;;  %p524_p9 = scmp.lt.u32.totalorder %s520_s21, %s763_s0 }
  0x19   :  { %p526_p10 = pnand %p524_p9, %p521_p8 }
  0x1b   :  { %529 = shalt.err (!%p526_p10)
}
  0x1c   :  { %s530_s1 = scalar_lea.vmem %s23_s16, 64  ;;  %p535_p12 = scmp.lt.s32.totalorder %s23_s16, %s23_s16 }
  0x1d   :  { %p531_p11 = scmp.ne.s32.totalorder %s23_s16, %s530_s1  ;;  %p536_p13 = scmp.lt.s32.totalorder %s530_s1, %s530_s1 }
  0x1f   :  { %p537_p0 = por %p536_p13, %p535_p12 }
  0x21   :  { %p538_p1 = pnand %p537_p0, %p531_p11 }
  0x23   :  { %541 = shalt.err (!%p538_p1)
}
  0x24   :  { %25 = dma.hbm_to_vmem [thread:$0]  %s763_s0, 64, %s23_s16, [#allocation3]  }
  0x25   :  { %s542_s30 = scalar_lea.hbm %s766_s3, 1024 }
  0x26   :  { %p543_p2 = scmp.ne.s32.totalorder %s766_s3, %s542_s30  ;;  %p546_p3 = scmp.lt.u32.totalorder %s542_s30, %s766_s3 }
  0x28   :  { %p548_p4 = pnand %p546_p3, %p543_p2 }
  0x2a   :  { %551 = shalt.err (!%p548_p4)
}
  0x2b   :  { %s552_s14 = scalar_lea.vmem %s46_s18, 1024  ;;  %p557_p6 = scmp.lt.s32.totalorder %s46_s18, %s46_s18 }
  0x2c   :  { %p553_p5 = scmp.ne.s32.totalorder %s46_s18, %s552_s14  ;;  %p558_p7 = scmp.lt.s32.totalorder %s552_s14, %s552_s14 }
  0x2e   :  { %p559_p8 = por %p558_p7, %p557_p6 }
  0x30   :  { %p560_p9 = pnand %p559_p8, %p553_p5 }
  0x32   :  { %563 = shalt.err (!%p560_p9)
}
  0x33   :  { %51 = dma.hbm_to_vmem [thread:$0]  %s766_s3, 1024, %s46_s18, [#allocation6], %s617_s11, %s617_s11, %s618_s12  }
  0x34   :  { %s621_s16 = smov [#allocation8]   ;;  %s564_s21 = scalar_lea.hbm %s768_s5, 1024 }
  0x35   :  { %s59_s17 = sshll.u32 %s621_s16, 4  ;;  %p565_p10 = scmp.ne.s32.totalorder %s768_s5, %s564_s21  ;;  %s60_s17 = int_to_ptr.vmem [resolvable:$true] %s59_s17 }
  0x36   :  { %p568_p11 = scmp.lt.u32.totalorder %s564_s21, %s768_s5 }
  0x38   :  { %p570_p12 = pnand %p568_p11, %p565_p10 }
  0x3a   :  { %573 = shalt.err (!%p570_p12)
}
  0x3b   :  { %s574_s1 = scalar_lea.vmem %s60_s17, 1024  ;;  %p579_p0 = scmp.lt.s32.totalorder %s60_s17, %s60_s17 }
  0x3c   :  { %p575_p13 = scmp.ne.s32.totalorder %s60_s17, %s574_s1  ;;  %p580_p1 = scmp.lt.s32.totalorder %s574_s1, %s574_s1 }
  0x3e   :  { %p581_p2 = por %p580_p1, %p579_p0 }
  0x40   :  { %p582_p3 = pnand %p581_p2, %p575_p13 }
  0x42   :  { %585 = shalt.err (!%p582_p3)
}
  0x43   :  { %65 = dma.hbm_to_vmem [thread:$0]  %s768_s5, 1024, %s60_s17, [#allocation9], %s617_s11, %s617_s11, %s618_s12  }
  0x44   :  { %608 = dma.done.wait [#allocation3], 64  }
  0x45   :  { %609 = vsyncadd [#allocation3], 4294967232 }
  0x46   :  { %610 = dma.done.wait [#allocation6], 1152  }
  0x47   :  { %611 = vsyncadd [#allocation6], 4294966144 }
  0x48   :  { %612 = dma.done.wait [#allocation9], 1024  }
  0x49   :  { %613 = vsyncadd [#allocation9], 4294966272  ;;  %v622_v0 = vmov 0.0   ;;  %vm623_vm0 = vmmov 0   ;;  %v481_v1 = vld [vmem:[#allocation5] sm:$0xff]   ;;  %vm97_vm1 = vcmask 130048  }
  0x4a   :  { %426 = vmatprep.subr.bf16.mxu0 %v622_v0  ;;  %428 = vmatprep.mubr.msk.bf16.mxu0 %vm623_vm0, %v622_v0  ;;  %v81_v2 = vld [vmem:[#allocation2] sm:$0xf]  ;;  %v482_v3 = vld [vmem:[#allocation7] sm:$0xff]   ;;  %v483_v4 = vld [vmem:[#allocation7 + $0x8] sm:$0xff]   ;;  %s624_s28 = smov [#allocation10]  }
  0x4b   :  { %432 = vmatprep.subr.bf16.mxu1 %v622_v0  ;;  %448 = vmatprep.mubr.msk.bf16.mxu1 %vm623_vm0, %v622_v0  ;;  %v484_v5 = vld [vmem:[#allocation7 + $0x10] sm:$0xff]   ;;  %v485_v6 = vld [vmem:[#allocation7 + $0x18] sm:$0xff]   ;;  %v486_v7 = vld [vmem:[#allocation7 + $0x20] sm:$0xff]   ;;  %s374_s29 = sshll.u32 %s624_s28, 4  ;;  %s375_s29 = int_to_ptr.vmem [resolvable:$true] %s374_s29 }
  0x4c   :  { %427 = vmatpush3.bf16.msra.mxu0 %v481_v1  ;;  %433 = vmatpush3.bf16.msra.mxu1 %v482_v3  ;;  %v487_v8 = vld [vmem:[#allocation7 + $0x28] sm:$0xff]   ;;  %v488_v9 = vld [vmem:[#allocation7 + $0x30] sm:$0xff]   ;;  %v489_v10 = vld [vmem:[#allocation7 + $0x38] sm:$0xff]   ;;  %p591_p5 = scmp.lt.s32.totalorder %s375_s29, %s375_s29 }
  0x4d   :  { %452 = vmatprep.subr.bf16.mxu0 %v622_v0  ;;  %434 = vmatprep.subr.bf16.mxu1 %v622_v0  ;;  %v490_v11 = vld [vmem:[#allocation8] sm:$0xff]   ;;  %v491_v12 = vld [vmem:[#allocation8 + $0x8] sm:$0xff]   ;;  %v492_v13 = vld [vmem:[#allocation8 + $0x10] sm:$0xff]  }
  0x4e   :  { %v493_v14 = vld [vmem:[#allocation8 + $0x18] sm:$0xff]   ;;  %v494_v15 = vld [vmem:[#allocation8 + $0x20] sm:$0xff]   ;;  %v495_v16 = vld [vmem:[#allocation8 + $0x28] sm:$0xff]  }
  0x4f   :  { %429 = vmatmul.mubr.msk.bf16.vlgmr.msra.gmra.mrb[0].mxu0 %vm97_vm1, %v81_v2  ;;  %v385_v17 = vld [vmem:[%s765_s2] ss:$0 sm:$0xff]  ;;  %v497_v26 = vld [vmem:[#allocation8 + $0x38] sm:$0xff]  }
  0x50   :  { %468 = vmatprep.mubr.msk.bf16.mxu0 %vm623_vm0, %v622_v0  ;;  %435 = vmatpush3.bf16.msra.mxu1 %v483_v4  ;;  %v496_v25 = vld [vmem:[#allocation8 + $0x30] sm:$0xff]  }
  0x51   :  { %436 = vmatprep.subr.bf16.mxu1 %v622_v0  ;;  %453 = vmatpush3.bf16.msra.mxu0 %v490_v11  ;;  %v388_v27 = vld [vmem:[%s767_s4] ss:$0 sm:$0xff]  ;;  %s586_s4 = scalar_lea.vmem %s375_s29, 128 }
  0x52   :  { %454 = vmatprep.subr.bf16.mxu0 %v622_v0  ;;  %v397_v35 = vld [vmem:[%s769_s6] ss:$0 sm:$0xff]  ;;  %p587_p4 = scmp.ne.s32.totalorder %s375_s29, %s586_s4  ;;  %p592_p6 = scmp.lt.s32.totalorder %s586_s4, %s586_s4 }
  0x54   :  { %437 = vmatpush3.bf16.msra.mxu1 %v484_v5  ;;  %p593_p7 = por %p592_p6, %p591_p5 }
  0x55   :  { %438 = vmatprep.subr.bf16.mxu1 %v622_v0  ;;  %455 = vmatpush3.bf16.msra.mxu0 %v491_v12 }
  0x56   :  { %456 = vmatprep.subr.bf16.mxu0 %v622_v0  ;;  %p594_p8 = pnand %p593_p7, %p587_p4 }
  0x58   :  { %439 = vmatpush3.bf16.msra.mxu1 %v485_v6 }
  0x59   :  { %440 = vmatprep.subr.bf16.mxu1 %v622_v0  ;;  %457 = vmatpush3.bf16.msra.mxu0 %v492_v13 }
  0x5a   :  { %458 = vmatprep.subr.bf16.mxu0 %v622_v0 }
  0x5c   :  { %441 = vmatpush3.bf16.msra.mxu1 %v486_v7 }
  0x5d   :  { %442 = vmatprep.subr.bf16.mxu1 %v622_v0  ;;  %459 = vmatpush3.bf16.msra.mxu0 %v493_v14 }
  0x5e   :  { %460 = vmatprep.subr.bf16.mxu0 %v622_v0 }
  0x60   :  { %443 = vmatpush3.bf16.msra.mxu1 %v487_v8 }
  0x61   :  { %444 = vmatprep.subr.bf16.mxu1 %v622_v0  ;;  %461 = vmatpush3.bf16.msra.mxu0 %v494_v15 }
  0x62   :  { %462 = vmatprep.subr.bf16.mxu0 %v622_v0 }
  0x64   :  { %445 = vmatpush3.bf16.msra.mxu1 %v488_v9 }
  0x65   :  { %446 = vmatprep.subr.bf16.mxu1 %v622_v0  ;;  %463 = vmatpush3.bf16.msra.mxu0 %v495_v16 }
  0x66   :  { %464 = vmatprep.subr.bf16.mxu0 %v622_v0 }
  0x68   :  { %447 = vmatpush3.bf16.msra.mxu1 %v489_v10 }
  0x69   :  { %465 = vmatpush3.bf16.msra.mxu0 %v496_v25 }
  0x6a   :  { %466 = vmatprep.subr.bf16.mxu0 %v622_v0 }
  0x6d   :  { %467 = vmatpush3.bf16.msra.mxu0 %v497_v26 }
 0x122   :  { %v135_v18 = vpop.f32.mrb[0].mxu0 }
 0x123   :  { %v136_v19 = vadd.f32 %v385_v17, %v135_v18  ;;  %v430_v20 = vpop.f32.mrb[1].mxu0 }
 0x124   :  { %v138_v21 = vpop.f32.mrb[2].mxu0 }
 0x125   :  { %v141_v22 = vmax.f32 %v136_v19, 0.0  ;;  %v431_v23 = vpop.f32.mrb[3].mxu0 }
 0x127   :  { %v142_v24 = vpack.c.bf16 %v141_v22, %v141_v22 }
 0x129   :  { %449 = vmatmul.mubr.bf16.vlgmr.msra.gmra.mrb[0].mxu1 %v142_v24 }
 0x1fc   :  { %v248_v28 = vpop.f32.mrb[0].mxu1 }
 0x1fd   :  { %v249_v29 = vadd.f32 %v388_v27, %v248_v28  ;;  %v450_v30 = vpop.f32.mrb[1].mxu1 }
 0x1fe   :  { %v251_v31 = vpop.f32.mrb[2].mxu1 }
 0x1ff   :  { %v254_v32 = vmax.f32 %v249_v29, 0.0  ;;  %v451_v33 = vpop.f32.mrb[3].mxu1 }
 0x201   :  { %v255_v34 = vpack.c.bf16 %v254_v32, %v254_v32 }
 0x203   :  { %469 = vmatmul.mubr.bf16.vlgmr.msra.gmra.mrb[4].mxu0 %v255_v34 }
 0x2d6   :  { %v361_v36 = vpop.f32.mrb[4].mxu0 }
 0x2d7   :  { %v362_v37 = vadd.f32 %v397_v35, %v361_v36  ;;  %v470_v38 = vpop.f32.mrb[5].mxu0 }
 0x2d8   :  { %v364_v39 = vpop.f32.mrb[6].mxu0 }
 0x2d9   :  { %367 = vst [vmem:[#allocation10] sm:$0xff] %v362_v37  ;;  %v471_v40 = vpop.f32.mrb[7].mxu0 }
 0x2da   :  { %597 = shalt.err (!%p594_p8)
}
 0x2db   :  { %s598_s6 = scalar_lea.hbm %s770_s7, 128 }
 0x2dc   :  { %p599_p9 = scmp.ne.s32.totalorder %s770_s7, %s598_s6  ;;  %p602_p10 = scmp.lt.u32.totalorder %s598_s6, %s770_s7 }
 0x2de   :  { %p604_p11 = pnand %p602_p10, %p599_p9 }
 0x2e0   :  { %607 = shalt.err (!%p604_p11)
}
 0x2e1   :  { %377 = dma.vmem_to_hbm [thread:$0]  %s375_s29, 128, %s770_s7, [#allocation4]  }
 0x2e2   :  { %614 = dma.done.wait [#allocation4], 128  }
 0x2e3   :  { %615 = vsyncadd [#allocation4], 4294967168 }
 0x2e4   :  { %381 = vsyncpa [#allocation3], 1 }
 0x2e5   :  { %382 = vsyncpa [#allocation6], 1 }
 0x2e6   :  { %383 = vsyncpa [#allocation9], 1 }
 0x2e7   :  { %384 = vsyncpa [#allocation4], 1 }

</bundles_post_ra>
